<compile_context>
chip_gen: v7x
topology: tpu7x:2x2x1
jax: 0.10.0
libtpu: 0.0.40
codegen_flags: <defaults>
</compile_context>

<pallas_src>
import functools

import jax
import jax.numpy as jnp
from jax.experimental import pallas as pl
from jax.experimental.pallas import tpu as pltpu


def _hard_mish_kernel(x_ref, o_ref):
    x = x_ref[...]
    dt = x.dtype
    half = jnp.asarray(0.5, dt)
    two = jnp.asarray(2.0, dt)
    zero = jnp.asarray(0.0, dt)
    # 0.5 * x * clamp(x + 2, 0, 2)
    o_ref[...] = (half * x * jnp.clip(x + two, zero, two)).astype(o_ref.dtype)


# Lane-dense candidates (all multiples of 128); widest divisor of n wins.
_LANE_CANDIDATES = (4096, 2048, 1024, 512, 256, 128)
_TARGET_BLOCK_BYTES = 4 * 1024 * 1024      # ~4 MiB per block (roofline plateau)


def _hard_mish_impl(x):
    orig_shape = x.shape
    orig_dtype = x.dtype
    n = x.size
    if n == 0:
        return x

    x_flat = x.reshape(-1)  # free for contiguous arrays

    # Widest lane count that divides n -> no pad, no extra HBM copy.
    lanes = None
    for cand in _LANE_CANDIDATES:
        if n % cand == 0:
            lanes = cand
            break
    padded = lanes is None
    if padded:
        lanes = 128
        n_pad = pl.cdiv(n, lanes) * lanes
        x_flat = jnp.pad(x_flat, (0, n_pad - n))
    else:
        n_pad = n

    rows = n_pad // lanes
    itemsize = jnp.dtype(orig_dtype).itemsize
    max_rows = max(1, _TARGET_BLOCK_BYTES // (lanes * itemsize))
    if max_rows >= rows:
        tile_rows = rows                          # whole slab is one block
    else:
        tile_rows = max(8, (max_rows // 8) * 8)   # keep (8,128) divisibility

    x2d = x_flat.reshape(rows, lanes)
    grid = (pl.cdiv(rows, tile_rows),)            # ragged last block is fine

    out2d = pl.pallas_call(
        _hard_mish_kernel,
        out_shape=jax.ShapeDtypeStruct((rows, lanes), orig_dtype),
        grid=grid,
        in_specs=[pl.BlockSpec((tile_rows, lanes), lambda i: (i, 0))],
        out_specs=pl.BlockSpec((tile_rows, lanes), lambda i: (i, 0)),
        compiler_params=pltpu.CompilerParams(
            dimension_semantics=("parallel",),
            vmem_limit_bytes=32 * 1024 * 1024,
        ),
    )(x2d)

    if padded:
        return out2d.reshape(-1)[:n].reshape(orig_shape)
    return out2d.reshape(orig_shape)


@functools.partial(jax.jit, static_argnums=())
def hard_mish_pallas(x):
    """HardMish forward: 0.5 * x * clamp(x + 2, 0, 2). Shape & dtype preserving."""
    return _hard_mish_impl(x)


def _reference(x):
    return 0.5 * x * jnp.clip(x + 2.0, 0.0, 2.0)


if __name__ == "__main__":
    key = jax.random.PRNGKey(0)

    # NCHW activation-style input (n = 2048 -> divides lane candidates, no pad).
    x = jax.random.normal(key, (2, 4, 16, 16), dtype=jnp.float32) * 4.0
    y = jax.block_until_ready(hard_mish_pallas(x))
    y_ref = _reference(x)
    assert y.shape == x.shape and y.dtype == x.dtype
    assert jnp.allclose(y, y_ref, atol=1e-6, rtol=1e-6)

    # Odd-sized input exercising the padded / ragged path.
    x2 = jax.random.normal(jax.random.PRNGKey(1), (3, 5, 7, 11), dtype=jnp.float32) * 4.0
    y2 = jax.block_until_ready(hard_mish_pallas(x2))
    y2_ref = _reference(x2)
    assert y2.shape == x2.shape and y2.dtype == x2.dtype
    assert jnp.allclose(y2, y2_ref, atol=1e-6, rtol=1e-6)

    # bf16 path (compute stays in bf16).
    x3 = jax.random.normal(jax.random.PRNGKey(2), (2, 8, 32), dtype=jnp.bfloat16) * 4.0
    y3 = jax.block_until_ready(hard_mish_pallas(x3))
    y3_ref = _reference(x3.astype(jnp.float32)).astype(jnp.bfloat16)
    assert y3.shape == x3.shape and y3.dtype == x3.dtype
    assert jnp.allclose(y3.astype(jnp.float32), y3_ref.astype(jnp.float32),
                        atol=2e-2, rtol=2e-2)

    print("KERNEL_OK")
</pallas_src>

<mosaic_0001>
module attributes {stable_mosaic.version = 11 : i64} {
  func.func @_hard_mish_kernel(%arg0: i32, %arg1: memref<1x2048xf32, #tpu.memory_space<vmem>>, %arg2: memref<1x2048xf32, #tpu.memory_space<vmem>>) attributes {dimension_semantics = [#tpu.dimension_semantics<parallel>], iteration_bounds = array<i64: 1>, scalar_prefetch = 0 : i64, scratch_operands = 0 : i64, tpu.core_type = #tpu.core_type<tc>, window_params = [{transform_indices = @transform_0, window_bounds = array<i64: 1, 2048>}, {transform_indices = @transform_1, window_bounds = array<i64: 1, 2048>}]} {
    %c0 = arith.constant 0 : index
    %c0_0 = arith.constant 0 : index
    %0 = vector.load %arg1[%c0, %c0_0] : memref<1x2048xf32, #tpu.memory_space<vmem>>, vector<1x2048xf32>
    %cst = arith.constant 5.000000e-01 : f32
    %1 = vector.broadcast %cst : f32 to vector<1x2048xf32>
    %2 = arith.mulf %1, %0 : vector<1x2048xf32>
    %cst_1 = arith.constant 2.000000e+00 : f32
    %3 = vector.broadcast %cst_1 : f32 to vector<1x2048xf32>
    %4 = arith.addf %0, %3 : vector<1x2048xf32>
    %cst_2 = arith.constant 0.000000e+00 : f32
    %cst_3 = arith.constant 2.000000e+00 : f32
    %5 = vector.broadcast %cst_2 : f32 to vector<1x2048xf32>
    %6 = arith.maximumf %5, %4 : vector<1x2048xf32>
    %7 = vector.broadcast %cst_3 : f32 to vector<1x2048xf32>
    %8 = arith.minimumf %7, %6 : vector<1x2048xf32>
    %9 = arith.mulf %2, %8 : vector<1x2048xf32>
    %c0_4 = arith.constant 0 : index
    %c0_5 = arith.constant 0 : index
    %10 = vector.load %arg2[%c0_4, %c0_5] : memref<1x2048xf32, #tpu.memory_space<vmem>>, vector<1x2048xf32>
    tpu.vector_store %arg2[%c0_4, %c0_5], %9 {strides = array<i32>} : memref<1x2048xf32, #tpu.memory_space<vmem>>, vector<1x2048xf32>,
    return
  }
  func.func @transform_0(%arg0: i32) -> (i32, i32) {
    %c0_i32 = arith.constant 0 : i32
    %c0_i32_0 = arith.constant 0 : i32
    return %arg0, %c0_i32 : i32, i32
  }
  func.func @transform_1(%arg0: i32) -> (i32, i32) {
    %c0_i32 = arith.constant 0 : i32
    %c0_i32_0 = arith.constant 0 : i32
    return %arg0, %c0_i32 : i32, i32
  }
}

</mosaic_0001>

<bundles_post_ra>
// kernel: hard_mish_pallas.1
= control target key start
LH: loop header
LB: loop body
LE: loop exit
PB: predicated region body
PF: predicated region fallthrough
CT: control target
= control target key end

     0   :  { %s48_s0 = inlined_call_operand.vmem [shape: f32[1,2048], index: 0, kind: input, shape index: {}]   ;;  %s49_s1 = inlined_call_operand.vmem [shape: f32[1,2048], index: 1, kind: output, shape index: {}]  }
   0x1   :  { %v8_v0 = vld [vmem:[%s48_s0] sm:$0xff]  ;;  %v9_v1 = vld [vmem:[%s48_s0 + $0x8] sm:$0xff] }
   0x2   :  { %v12_v2 = vadd.f32 2.0, %v8_v0  ;;  %v13_v3 = vadd.f32 2.0, %v9_v1  ;;  %v10_v4 = vmul.f32 0.5, %v8_v0  ;;  %v11_v6 = vmul.f32 0.5, %v9_v1 }
   0x4   :  { %v14_v5 = vmax.f32 %v12_v2, 0.0  ;;  %v15_v7 = vmax.f32 %v13_v3, 0.0 }
   0x6   :  { %v16_v8 = vmin.f32 %v14_v5, 2.0  ;;  %v17_v9 = vmin.f32 %v15_v7, 2.0 }
   0x8   :  { %v18_v10 = vmul.f32 %v16_v8, %v10_v4  ;;  %v19_v11 = vmul.f32 %v17_v9, %v11_v6 }
   0xa   :  { %20 = vst [vmem:[%s49_s1] sm:$0xff] %v18_v10  ;;  %21 = vst [vmem:[%s49_s1 + $0x8] sm:$0xff] %v19_v11 }

</bundles_post_ra>
